<compile_context>
chip_gen: v7x
topology: tpu7x:2x2x1
jax: 0.10.0
libtpu: 0.0.40
codegen_flags: <defaults>
</compile_context>

<pallas_src>
import functools
import math

import jax
import jax.numpy as jnp
from jax.experimental import pallas as pl
from jax.experimental.pallas import tpu as pltpu

H = 32        # hidden size
F = 64        # FFN intermediate size
L = 8         # sequence length
PAD_ID = 1    # RoBERTa pad token id (inputs.ne(1) in the PyTorch code)


def _layernorm(x, g, b, eps=1e-5):
    mu = jnp.mean(x, axis=-1, keepdims=True)
    var = jnp.mean((x - mu) ** 2, axis=-1, keepdims=True)
    return (x - mu) * jax.lax.rsqrt(var + eps) * g + b


def _mm(a, w_ref):
    # bf16 operands into the MXU with f32 accumulation (fast path on v6e/v7x,
    # valid on v5e too; elementwise math elsewhere stays f32).
    return jnp.dot(a.astype(jnp.bfloat16), w_ref[...],
                   preferred_element_type=jnp.float32)


def encoder_kernel(x_ref, bias_ref,
                   ln0g_ref, ln0b_ref,
                   wqkv_ref, bqkv_ref,
                   wo_ref, bo_ref, ln1g_ref, ln1b_ref,
                   w1_ref, b1_ref, w2_ref, b2_ref, ln2g_ref, ln2b_ref,
                   wp_ref, bp_ref,
                   out_ref, *, tb, flat_attn):
    tbl = tb * L
    bf16 = jnp.bfloat16

    # x already holds word-embedding + position-embedding rows (gathered outside).
    x = x_ref[...]                                                  # (tb*L, H) f32
    h = _layernorm(x, ln0g_ref[...], ln0b_ref[...])

    # ---- fused Q|K|V projection: one (tbl,H)x(H,3H) MXU pass ----
    qkv = _mm(h, wqkv_ref) + bqkv_ref[...]                          # (tbl, 3H)
    q = qkv[:, :H]           # 1/sqrt(H) pre-folded into the Q weight/bias block
    k = qkv[:, H:2 * H]
    v = qkv[:, 2 * H:]

    if flat_attn:
        # One flat (tbl, tbl) score matmul; per-sequence structure + key padding are
        # enforced by the precomputed additive block-diagonal bias (bias_ref).
        qb = q.astype(bf16)
        kb = k.astype(bf16)
        vb = v.astype(bf16)
        scores = jax.lax.dot_general(qb, kb, (((1,), (1,)), ((), ())),
                                     preferred_element_type=jnp.float32)  # (tbl, tbl)
        scores = scores + bias_ref[0]
        # NOTE: a fully-padded sequence gets a uniform (not NaN) softmax after the max
        # subtraction; only the CLS row of each sequence is consumed downstream.
        scores = scores - jnp.max(scores, axis=-1, keepdims=True)
        p = jnp.exp(scores)
        p = p * pl.reciprocal(jnp.sum(p, axis=-1, keepdims=True), approx=True)
        ctx = jnp.dot(p.astype(bf16), vb,
                      preferred_element_type=jnp.float32)           # (tbl, H)
    else:
        # Larger per-step tiles: per-sequence batched attention (bias is (tb,1,L)).
        q3 = q.reshape(tb, L, H).astype(bf16)
        k3 = k.reshape(tb, L, H).astype(bf16)
        v3 = v.reshape(tb, L, H).astype(bf16)
        scores = jnp.einsum('bld,bmd->blm', q3, k3,
                            preferred_element_type=jnp.float32)     # (tb, L, L)
        scores = scores + bias_ref[...]
        scores = scores - jnp.max(scores, axis=-1, keepdims=True)
        p = jnp.exp(scores)
        p = p * pl.reciprocal(jnp.sum(p, axis=-1, keepdims=True), approx=True)
        ctx = jnp.einsum('blm,bmd->bld', p.astype(bf16), v3,
                         preferred_element_type=jnp.float32).reshape(tbl, H)

    attn = _mm(ctx, wo_ref) + bo_ref[...]
    h1 = _layernorm(h + attn, ln1g_ref[...], ln1b_ref[...])

    # ---- feed-forward ----
    ff = _mm(h1, w1_ref) + b1_ref[...]
    # TODO(synk): HF RoBERTa uses exact erf-GELU; tanh-approx GELU kept for the
    # portable Mosaic lowering of this stand-in encoder.
    ff = jax.nn.gelu(ff)
    ff = _mm(ff, w2_ref) + b2_ref[...]
    h2 = _layernorm(h1 + ff, ln2g_ref[...], ln2b_ref[...])

    # ---- pooler: first (CLS) token of every sequence -> dense -> tanh ----
    cls = h2.reshape(tb, L, H)[:, 0, :]                             # (tb, H)
    pooled = jnp.tanh(_mm(cls, wp_ref) + bp_ref[...])
    # TODO(synk): writeback is (TB, H) with H=32 lanes (512 B/step); a lane-dense
    # (1, TB*H) slab would need a sublane->lane merging reshape in-kernel.
    out_ref[...] = pooled


def pooled_encoder(input_ids, params):
    """Returns the pooled output (encoder(...)[1]), shape (2B, H)."""
    B2, Lc = input_ids.shape
    assert Lc == L

    # Grid selection: single fused step by default — the grid is a *serial* loop on
    # single-TensorCore chips (v5e/v6e), so splitting only adds per-step + duplicate
    # weight-DMA overhead.  Split into 2 "parallel" steps (v7x megacore) only once
    # each step still has >= 256 flattened matmul rows.
    if B2 % 16 == 0 and (B2 // 2) * L >= 256:
        G = 2
    else:
        G = 1
    TB = B2 // G
    TBL = TB * L
    assert TBL % 8 == 0, "flattened row block must be sublane-aligned"

    # Embedding gather + position add in plain XLA (tiny (B2*L, H) tensor).  This
    # replaces the former in-kernel one-hot matmul, which cost O(vocab) MXU work and
    # forced the whole (V, H) table to be resident (double-buffered) in VMEM.
    emb = params["word_emb"][input_ids] + params["pos_emb"][None, :, :]
    x_flat = emb.reshape(B2 * L, H).astype(jnp.float32)

    # attention_mask = inputs.ne(1) -> additive bias.
    not_pad = input_ids != PAD_ID                                   # (B2, L) bool
    flat_attn = TBL <= 128
    if flat_attn:
        # One (TBL, TBL) block-diagonal bias per grid step: 0 where (same sequence
        # AND key token not pad), -1e9 elsewhere.
        tok = jnp.arange(TBL)
        same_seq = (tok[:, None] // L) == (tok[None, :] // L)       # (TBL, TBL)
        bias = jnp.where(same_seq[None, :, :] & not_pad.reshape(G, 1, TBL),
                         0.0, -1e9).astype(jnp.float32)             # (G, TBL, TBL)
        bias_spec = pl.BlockSpec((1, TBL, TBL), lambda i: (i, 0, 0))
    else:
        bias = jnp.where(not_pad, 0.0, -1e9).astype(
            jnp.float32)[:, None, :]                                # (B2, 1, L)
        bias_spec = pl.BlockSpec((TB, 1, L), lambda i: (i, 0, 0))

    # Fused Q|K|V projection weight (H, 3H); 1/sqrt(H) folded into the Q block.
    inv_sqrt_h = 1.0 / math.sqrt(H)
    bf16 = jnp.bfloat16
    wqkv = jnp.concatenate(
        [params["wq"] * inv_sqrt_h, params["wk"], params["wv"]], axis=1).astype(bf16)
    bqkv = jnp.concatenate(
        [params["bq"] * inv_sqrt_h, params["bk"], params["bv"]], axis=1)

    weights = [
        params["ln0_g"], params["ln0_b"],
        wqkv, bqkv,
        params["wo"].astype(bf16), params["bo"],
        params["ln1_g"], params["ln1_b"],
        params["w1"].astype(bf16), params["b1"],
        params["w2"].astype(bf16), params["b2"],
        params["ln2_g"], params["ln2_b"],
        params["wp"].astype(bf16), params["bp"],
    ]

    def full_spec(arr):
        # TODO(synk): at real vocab/TB sizes on v7x, single-buffer these grid-invariant
        # weights (pipeline_mode=pl.Buffered(1)) to halve their VMEM footprint.
        nd = arr.ndim
        return pl.BlockSpec(arr.shape, lambda i, _nd=nd: (0,) * _nd)

    in_specs = ([pl.BlockSpec((TBL, H), lambda i: (i, 0)),          # embedded tokens
                 bias_spec]                                         # additive attn bias
                + [full_spec(w) for w in weights])

    out = pl.pallas_call(
        functools.partial(encoder_kernel, tb=TB, flat_attn=flat_attn),
        out_shape=jax.ShapeDtypeStruct((B2, H), jnp.float32),
        grid=(G,),
        in_specs=in_specs,
        out_specs=pl.BlockSpec((TB, H), lambda i: (i, 0)),
        compiler_params=pltpu.CompilerParams(
            dimension_semantics=("parallel",),
            vmem_limit_bytes=32 * 1024 * 1024),
    )(x_flat, bias, *weights)

    return out                                                      # (2B, H)


def model_forward(code_inputs, nl_inputs, params):
    """Mirrors Model.forward: returns (B, 2, H) stacked (code_vec, nl_vec) pairs."""
    inputs = jnp.concatenate([code_inputs, nl_inputs], axis=0)      # (2B, L)
    bs = code_inputs.shape[0]
    pooled = pooled_encoder(inputs, params)                         # (2B, H)
    code_vec = pooled[:bs]
    nl_vec = pooled[bs:]
    # for code, nl in zip(code_vec, nl_vec): cat(code[None], nl[None])[None] ...
    return jnp.stack([code_vec, nl_vec], axis=1)                    # (B, 2, H)


def init_params(key, vocab_size):
    ks = jax.random.split(key, 10)
    s = 0.02
    return {
        "word_emb": s * jax.random.normal(ks[0], (vocab_size, H), jnp.float32),
        "pos_emb": s * jax.random.normal(ks[1], (L, H), jnp.float32),
        "ln0_g": jnp.ones((1, H), jnp.float32),
        "ln0_b": jnp.zeros((1, H), jnp.float32),
        "wq": s * jax.random.normal(ks[2], (H, H), jnp.float32),
        "bq": jnp.zeros((1, H), jnp.float32),
        "wk": s * jax.random.normal(ks[3], (H, H), jnp.float32),
        "bk": jnp.zeros((1, H), jnp.float32),
        "wv": s * jax.random.normal(ks[4], (H, H), jnp.float32),
        "bv": jnp.zeros((1, H), jnp.float32),
        "wo": s * jax.random.normal(ks[5], (H, H), jnp.float32),
        "bo": jnp.zeros((1, H), jnp.float32),
        "ln1_g": jnp.ones((1, H), jnp.float32),
        "ln1_b": jnp.zeros((1, H), jnp.float32),
        "w1": s * jax.random.normal(ks[6], (H, F), jnp.float32),
        "b1": jnp.zeros((1, F), jnp.float32),
        "w2": s * jax.random.normal(ks[7], (F, H), jnp.float32),
        "b2": jnp.zeros((1, H), jnp.float32),
        "ln2_g": jnp.ones((1, H), jnp.float32),
        "ln2_b": jnp.zeros((1, H), jnp.float32),
        "wp": s * jax.random.normal(ks[8], (H, H), jnp.float32),
        "bp": jnp.zeros((1, H), jnp.float32),
    }


if __name__ == "__main__":
    B, V = 2, 64
    key = jax.random.PRNGKey(0)
    k_code, k_nl, k_par = jax.random.split(key, 3)

    code_inputs = jax.random.randint(k_code, (B, L), 2, V)   # avoid pad id by default
    nl_inputs = jax.random.randint(k_nl, (B, L), 2, V)
    # put some padding (token id 1) at the tails so the attention mask matters
    code_inputs = code_inputs.at[:, -2:].set(PAD_ID)
    nl_inputs = nl_inputs.at[:, -3:].set(PAD_ID)

    params = init_params(k_par, V)

    fwd = jax.jit(model_forward)
    out = fwd(code_inputs, nl_inputs, params)
    out = jax.block_until_ready(out)
    assert out.shape == (B, 2, H) and out.dtype == jnp.float32
    assert bool(jnp.all(jnp.isfinite(out)))
    print("KERNEL_OK")
</pallas_src>

<mosaic_0001>
module attributes {stable_mosaic.version = 11 : i64} {
  func.func @encoder_kernel(%arg0: i32, %arg1: memref<32x32xf32, #tpu.memory_space<vmem>>, %arg2: memref<1x32x32xf32, #tpu.memory_space<vmem>>, %arg3: memref<1x32xf32, #tpu.memory_space<vmem>>, %arg4: memref<1x32xf32, #tpu.memory_space<vmem>>, %arg5: memref<32x96xbf16, #tpu.memory_space<vmem>>, %arg6: memref<1x96xf32, #tpu.memory_space<vmem>>, %arg7: memref<32x32xbf16, #tpu.memory_space<vmem>>, %arg8: memref<1x32xf32, #tpu.memory_space<vmem>>, %arg9: memref<1x32xf32, #tpu.memory_space<vmem>>, %arg10: memref<1x32xf32, #tpu.memory_space<vmem>>, %arg11: memref<32x64xbf16, #tpu.memory_space<vmem>>, %arg12: memref<1x64xf32, #tpu.memory_space<vmem>>, %arg13: memref<64x32xbf16, #tpu.memory_space<vmem>>, %arg14: memref<1x32xf32, #tpu.memory_space<vmem>>, %arg15: memref<1x32xf32, #tpu.memory_space<vmem>>, %arg16: memref<1x32xf32, #tpu.memory_space<vmem>>, %arg17: memref<32x32xbf16, #tpu.memory_space<vmem>>, %arg18: memref<1x32xf32, #tpu.memory_space<vmem>>, %arg19: memref<4x32xf32, #tpu.memory_space<vmem>>) attributes {dimension_semantics = [#tpu.dimension_semantics<parallel>], iteration_bounds = array<i64: 1>, scalar_prefetch = 0 : i64, scratch_operands = 0 : i64, tpu.core_type = #tpu.core_type<tc>, window_params = [{transform_indices = @transform_0, window_bounds = array<i64: 32, 32>}, {transform_indices = @transform_1, window_bounds = array<i64: 1, 32, 32>}, {pipeline_mode = #tpu.pipeline_mode<synchronous>, transform_indices = @transform_2, window_bounds = array<i64: 1, 32>}, {pipeline_mode = #tpu.pipeline_mode<synchronous>, transform_indices = @transform_3, window_bounds = array<i64: 1, 32>}, {pipeline_mode = #tpu.pipeline_mode<synchronous>, transform_indices = @transform_4, window_bounds = array<i64: 32, 96>}, {pipeline_mode = #tpu.pipeline_mode<synchronous>, transform_indices = @transform_5, window_bounds = array<i64: 1, 96>}, {pipeline_mode = #tpu.pipeline_mode<synchronous>, transform_indices = @transform_6, window_bounds = array<i64: 32, 32>}, {pipeline_mode = #tpu.pipeline_mode<synchronous>, transform_indices = @transform_7, window_bounds = array<i64: 1, 32>}, {pipeline_mode = #tpu.pipeline_mode<synchronous>, transform_indices = @transform_8, window_bounds = array<i64: 1, 32>}, {pipeline_mode = #tpu.pipeline_mode<synchronous>, transform_indices = @transform_9, window_bounds = array<i64: 1, 32>}, {pipeline_mode = #tpu.pipeline_mode<synchronous>, transform_indices = @transform_10, window_bounds = array<i64: 32, 64>}, {pipeline_mode = #tpu.pipeline_mode<synchronous>, transform_indices = @transform_11, window_bounds = array<i64: 1, 64>}, {pipeline_mode = #tpu.pipeline_mode<synchronous>, transform_indices = @transform_12, window_bounds = array<i64: 64, 32>}, {pipeline_mode = #tpu.pipeline_mode<synchronous>, transform_indices = @transform_13, window_bounds = array<i64: 1, 32>}, {pipeline_mode = #tpu.pipeline_mode<synchronous>, transform_indices = @transform_14, window_bounds = array<i64: 1, 32>}, {pipeline_mode = #tpu.pipeline_mode<synchronous>, transform_indices = @transform_15, window_bounds = array<i64: 1, 32>}, {pipeline_mode = #tpu.pipeline_mode<synchronous>, transform_indices = @transform_16, window_bounds = array<i64: 32, 32>}, {pipeline_mode = #tpu.pipeline_mode<synchronous>, transform_indices = @transform_17, window_bounds = array<i64: 1, 32>}, {transform_indices = @transform_18, window_bounds = array<i64: 4, 32>}]} {
    %c0 = arith.constant 0 : index
    %c0_0 = arith.constant 0 : index
    %0 = vector.load %arg1[%c0, %c0_0] : memref<32x32xf32, #tpu.memory_space<vmem>>, vector<32x32xf32>
    %c0_1 = arith.constant 0 : index
    %c0_2 = arith.constant 0 : index
    %1 = vector.load %arg3[%c0_1, %c0_2] : memref<1x32xf32, #tpu.memory_space<vmem>>, vector<1x32xf32>
    %c0_3 = arith.constant 0 : index
    %c0_4 = arith.constant 0 : index
    %2 = vector.load %arg4[%c0_3, %c0_4] : memref<1x32xf32, #tpu.memory_space<vmem>>, vector<1x32xf32>
    %cst = arith.constant dense<0.000000e+00> : vector<32xf32>
    %3 = vector.multi_reduction <add>, %0, %cst [1] : vector<32x32xf32> to vector<32xf32>
    %4 = vector.shape_cast %3 : vector<32xf32> to vector<32x1xf32>
    %cst_5 = arith.constant 3.200000e+01 : f32
    %5 = vector.broadcast %cst_5 : f32 to vector<32x1xf32>
    %6 = arith.divf %4, %5 : vector<32x1xf32>
    %7 = vector.broadcast %6 : vector<32x1xf32> to vector<32x32xf32>
    %8 = arith.subf %0, %7 : vector<32x32xf32>
    %9 = arith.mulf %8, %8 : vector<32x32xf32>
    %cst_6 = arith.constant dense<0.000000e+00> : vector<32xf32>
    %10 = vector.multi_reduction <add>, %9, %cst_6 [1] : vector<32x32xf32> to vector<32xf32>
    %11 = vector.shape_cast %10 : vector<32xf32> to vector<32x1xf32>
    %cst_7 = arith.constant 3.200000e+01 : f32
    %12 = vector.broadcast %cst_7 : f32 to vector<32x1xf32>
    %13 = arith.divf %11, %12 : vector<32x1xf32>
    %14 = vector.broadcast %6 : vector<32x1xf32> to vector<32x32xf32>
    %15 = arith.subf %0, %14 : vector<32x32xf32>
    %cst_8 = arith.constant 9.99999974E-6 : f32
    %16 = vector.broadcast %cst_8 : f32 to vector<32x1xf32>
    %17 = arith.addf %13, %16 : vector<32x1xf32>
    %18 = math.rsqrt %17 : vector<32x1xf32>
    %19 = vector.broadcast %18 : vector<32x1xf32> to vector<32x32xf32>
    %20 = arith.mulf %15, %19 : vector<32x32xf32>
    %21 = vector.broadcast %1 : vector<1x32xf32> to vector<32x32xf32>
    %22 = arith.mulf %20, %21 : vector<32x32xf32>
    %23 = vector.broadcast %2 : vector<1x32xf32> to vector<32x32xf32>
    %24 = arith.addf %22, %23 : vector<32x32xf32>
    %25 = arith.truncf %24 : vector<32x32xf32> to vector<32x32xbf16>
    %c0_9 = arith.constant 0 : index
    %c0_10 = arith.constant 0 : index
    %26 = vector.load %arg5[%c0_9, %c0_10] : memref<32x96xbf16, #tpu.memory_space<vmem>>, vector<32x96xbf16>
    %cst_11 = arith.constant dense<0.000000e+00> : vector<32x96xf32>
    %27 = tpu.matmul %25, %26, %cst_11 {dimension_numbers = #tpu.dot_dimension_numbers<[1], [0], [0], [1], [0, 0, 1, 1], [], []>} : vector<32x32xbf16>, vector<32x96xbf16>, vector<32x96xf32> -> vector<32x96xf32>
    %c0_12 = arith.constant 0 : index
    %c0_13 = arith.constant 0 : index
    %28 = vector.load %arg6[%c0_12, %c0_13] : memref<1x96xf32, #tpu.memory_space<vmem>>, vector<1x96xf32>
    %29 = vector.broadcast %28 : vector<1x96xf32> to vector<32x96xf32>
    %30 = arith.addf %27, %29 : vector<32x96xf32>
    %31 = vector.extract_strided_slice %30 {offsets = [0, 0], sizes = [32, 32], strides = [1, 1]} : vector<32x96xf32> to vector<32x32xf32>
    %32 = vector.extract_strided_slice %30 {offsets = [0, 32], sizes = [32, 32], strides = [1, 1]} : vector<32x96xf32> to vector<32x32xf32>
    %33 = vector.extract_strided_slice %30 {offsets = [0, 64], sizes = [32, 32], strides = [1, 1]} : vector<32x96xf32> to vector<32x32xf32>
    %34 = arith.truncf %31 : vector<32x32xf32> to vector<32x32xbf16>
    %35 = arith.truncf %32 : vector<32x32xf32> to vector<32x32xbf16>
    %36 = arith.truncf %33 : vector<32x32xf32> to vector<32x32xbf16>
    %cst_14 = arith.constant dense<0.000000e+00> : vector<32x32xf32>
    %37 = tpu.matmul %34, %35, %cst_14 {dimension_numbers = #tpu.dot_dimension_numbers<[1], [1], [0], [0], [0, 0, 1, 0], [], []>} : vector<32x32xbf16>, vector<32x32xbf16>, vector<32x32xf32> -> vector<32x32xf32>
    %c0_15 = arith.constant 0 : index
    %c0_16 = arith.constant 0 : index
    %c0_17 = arith.constant 0 : index
    %38 = vector.load %arg2[%c0_15, %c0_16, %c0_17] : memref<1x32x32xf32, #tpu.memory_space<vmem>>, vector<1x32x32xf32>
    %39 = vector.shape_cast %38 : vector<1x32x32xf32> to vector<32x32xf32>
    %40 = arith.addf %37, %39 : vector<32x32xf32>
    %cst_18 = arith.constant dense<0xFF800000> : vector<32xf32>
    %41 = vector.multi_reduction <maximumf>, %40, %cst_18 [1] : vector<32x32xf32> to vector<32xf32>
    %42 = vector.shape_cast %41 : vector<32xf32> to vector<32x1xf32>
    %43 = vector.broadcast %42 : vector<32x1xf32> to vector<32x32xf32>
    %44 = arith.subf %40, %43 : vector<32x32xf32>
    %45 = math.exp %44 : vector<32x32xf32>
    %cst_19 = arith.constant dense<0.000000e+00> : vector<32xf32>
    %46 = vector.multi_reduction <add>, %45, %cst_19 [1] : vector<32x32xf32> to vector<32xf32>
    %47 = vector.shape_cast %46 : vector<32xf32> to vector<32x1xf32>
    %48 = tpu.reciprocal %47 {approx = true} : vector<32x1xf32> -> vector<32x1xf32>
    %49 = vector.broadcast %48 : vector<32x1xf32> to vector<32x32xf32>
    %50 = arith.mulf %45, %49 : vector<32x32xf32>
    %51 = arith.truncf %50 : vector<32x32xf32> to vector<32x32xbf16>
    %cst_20 = arith.constant dense<0.000000e+00> : vector<32x32xf32>
    %52 = tpu.matmul %51, %36, %cst_20 {dimension_numbers = #tpu.dot_dimension_numbers<[1], [0], [0], [1], [0, 0, 1, 1], [], []>} : vector<32x32xbf16>, vector<32x32xbf16>, vector<32x32xf32> -> vector<32x32xf32>
    %53 = arith.truncf %52 : vector<32x32xf32> to vector<32x32xbf16>
    %c0_21 = arith.constant 0 : index
    %c0_22 = arith.constant 0 : index
    %54 = vector.load %arg7[%c0_21, %c0_22] : memref<32x32xbf16, #tpu.memory_space<vmem>>, vector<32x32xbf16>
    %cst_23 = arith.constant dense<0.000000e+00> : vector<32x32xf32>
    %55 = tpu.matmul %53, %54, %cst_23 {dimension_numbers = #tpu.dot_dimension_numbers<[1], [0], [0], [1], [0, 0, 1, 1], [], []>} : vector<32x32xbf16>, vector<32x32xbf16>, vector<32x32xf32> -> vector<32x32xf32>
    %c0_24 = arith.constant 0 : index
    %c0_25 = arith.constant 0 : index
    %56 = vector.load %arg8[%c0_24, %c0_25] : memref<1x32xf32, #tpu.memory_space<vmem>>, vector<1x32xf32>
    %57 = vector.broadcast %56 : vector<1x32xf32> to vector<32x32xf32>
    %58 = arith.addf %55, %57 : vector<32x32xf32>
    %59 = arith.addf %24, %58 : vector<32x32xf32>
    %c0_26 = arith.constant 0 : index
    %c0_27 = arith.constant 0 : index
    %60 = vector.load %arg9[%c0_26, %c0_27] : memref<1x32xf32, #tpu.memory_space<vmem>>, vector<1x32xf32>
    %c0_28 = arith.constant 0 : index
    %c0_29 = arith.constant 0 : index
    %61 = vector.load %arg10[%c0_28, %c0_29] : memref<1x32xf32, #tpu.memory_space<vmem>>, vector<1x32xf32>
    %cst_30 = arith.constant dense<0.000000e+00> : vector<32xf32>
    %62 = vector.multi_reduction <add>, %59, %cst_30 [1] : vector<32x32xf32> to vector<32xf32>
    %63 = vector.shape_cast %62 : vector<32xf32> to vector<32x1xf32>
    %cst_31 = arith.constant 3.200000e+01 : f32
    %64 = vector.broadcast %cst_31 : f32 to vector<32x1xf32>
    %65 = arith.divf %63, %64 : vector<32x1xf32>
    %66 = vector.broadcast %65 : vector<32x1xf32> to vector<32x32xf32>
    %67 = arith.subf %59, %66 : vector<32x32xf32>
    %68 = arith.mulf %67, %67 : vector<32x32xf32>
    %cst_32 = arith.constant dense<0.000000e+00> : vector<32xf32>
    %69 = vector.multi_reduction <add>, %68, %cst_32 [1] : vector<32x32xf32> to vector<32xf32>
    %70 = vector.shape_cast %69 : vector<32xf32> to vector<32x1xf32>
    %cst_33 = arith.constant 3.200000e+01 : f32
    %71 = vector.broadcast %cst_33 : f32 to vector<32x1xf32>
    %72 = arith.divf %70, %71 : vector<32x1xf32>
    %73 = vector.broadcast %65 : vector<32x1xf32> to vector<32x32xf32>
    %74 = arith.subf %59, %73 : vector<32x32xf32>
    %cst_34 = arith.constant 9.99999974E-6 : f32
    %75 = vector.broadcast %cst_34 : f32 to vector<32x1xf32>
    %76 = arith.addf %72, %75 : vector<32x1xf32>
    %77 = math.rsqrt %76 : vector<32x1xf32>
    %78 = vector.broadcast %77 : vector<32x1xf32> to vector<32x32xf32>
    %79 = arith.mulf %74, %78 : vector<32x32xf32>
    %80 = vector.broadcast %60 : vector<1x32xf32> to vector<32x32xf32>
    %81 = arith.mulf %79, %80 : vector<32x32xf32>
    %82 = vector.broadcast %61 : vector<1x32xf32> to vector<32x32xf32>
    %83 = arith.addf %81, %82 : vector<32x32xf32>
    %84 = arith.truncf %83 : vector<32x32xf32> to vector<32x32xbf16>
    %c0_35 = arith.constant 0 : index
    %c0_36 = arith.constant 0 : index
    %85 = vector.load %arg11[%c0_35, %c0_36] : memref<32x64xbf16, #tpu.memory_space<vmem>>, vector<32x64xbf16>
    %cst_37 = arith.constant dense<0.000000e+00> : vector<32x64xf32>
    %86 = tpu.matmul %84, %85, %cst_37 {dimension_numbers = #tpu.dot_dimension_numbers<[1], [0], [0], [1], [0, 0, 1, 1], [], []>} : vector<32x32xbf16>, vector<32x64xbf16>, vector<32x64xf32> -> vector<32x64xf32>
    %c0_38 = arith.constant 0 : index
    %c0_39 = arith.constant 0 : index
    %87 = vector.load %arg12[%c0_38, %c0_39] : memref<1x64xf32, #tpu.memory_space<vmem>>, vector<1x64xf32>
    %88 = vector.broadcast %87 : vector<1x64xf32> to vector<32x64xf32>
    %89 = arith.addf %86, %88 : vector<32x64xf32>
    %90 = arith.mulf %89, %89 : vector<32x64xf32>
    %91 = arith.mulf %89, %90 : vector<32x64xf32>
    %cst_40 = arith.constant 4.471500e-02 : f32
    %92 = vector.broadcast %cst_40 : f32 to vector<32x64xf32>
    %93 = arith.mulf %92, %91 : vector<32x64xf32>
    %94 = arith.addf %89, %93 : vector<32x64xf32>
    %cst_41 = arith.constant 0.797884583 : f32
    %95 = vector.broadcast %cst_41 : f32 to vector<32x64xf32>
    %96 = arith.mulf %95, %94 : vector<32x64xf32>
    %97 = math.tanh %96 : vector<32x64xf32>
    %cst_42 = arith.constant 1.000000e+00 : f32
    %98 = vector.broadcast %cst_42 : f32 to vector<32x64xf32>
    %99 = arith.addf %98, %97 : vector<32x64xf32>
    %cst_43 = arith.constant 5.000000e-01 : f32
    %100 = vector.broadcast %cst_43 : f32 to vector<32x64xf32>
    %101 = arith.mulf %100, %99 : vector<32x64xf32>
    %102 = arith.mulf %89, %101 : vector<32x64xf32>
    %103 = arith.truncf %102 : vector<32x64xf32> to vector<32x64xbf16>
    %c0_44 = arith.constant 0 : index
    %c0_45 = arith.constant 0 : index
    %104 = vector.load %arg13[%c0_44, %c0_45] : memref<64x32xbf16, #tpu.memory_space<vmem>>, vector<64x32xbf16>
    %cst_46 = arith.constant dense<0.000000e+00> : vector<32x32xf32>
    %105 = tpu.matmul %103, %104, %cst_46 {dimension_numbers = #tpu.dot_dimension_numbers<[1], [0], [0], [1], [0, 0, 1, 1], [], []>} : vector<32x64xbf16>, vector<64x32xbf16>, vector<32x32xf32> -> vector<32x32xf32>
    %c0_47 = arith.constant 0 : index
    %c0_48 = arith.constant 0 : index
    %106 = vector.load %arg14[%c0_47, %c0_48] : memref<1x32xf32, #tpu.memory_space<vmem>>, vector<1x32xf32>
    %107 = vector.broadcast %106 : vector<1x32xf32> to vector<32x32xf32>
    %108 = arith.addf %105, %107 : vector<32x32xf32>
    %109 = arith.addf %83, %108 : vector<32x32xf32>
    %c0_49 = arith.constant 0 : index
    %c0_50 = arith.constant 0 : index
    %110 = vector.load %arg15[%c0_49, %c0_50] : memref<1x32xf32, #tpu.memory_space<vmem>>, vector<1x32xf32>
    %c0_51 = arith.constant 0 : index
    %c0_52 = arith.constant 0 : index
    %111 = vector.load %arg16[%c0_51, %c0_52] : memref<1x32xf32, #tpu.memory_space<vmem>>, vector<1x32xf32>
    %cst_53 = arith.constant dense<0.000000e+00> : vector<32xf32>
    %112 = vector.multi_reduction <add>, %109, %cst_53 [1] : vector<32x32xf32> to vector<32xf32>
    %113 = vector.shape_cast %112 : vector<32xf32> to vector<32x1xf32>
    %cst_54 = arith.constant 3.200000e+01 : f32
    %114 = vector.broadcast %cst_54 : f32 to vector<32x1xf32>
    %115 = arith.divf %113, %114 : vector<32x1xf32>
    %116 = vector.broadcast %115 : vector<32x1xf32> to vector<32x32xf32>
    %117 = arith.subf %109, %116 : vector<32x32xf32>
    %118 = arith.mulf %117, %117 : vector<32x32xf32>
    %cst_55 = arith.constant dense<0.000000e+00> : vector<32xf32>
    %119 = vector.multi_reduction <add>, %118, %cst_55 [1] : vector<32x32xf32> to vector<32xf32>
    %120 = vector.shape_cast %119 : vector<32xf32> to vector<32x1xf32>
    %cst_56 = arith.constant 3.200000e+01 : f32
    %121 = vector.broadcast %cst_56 : f32 to vector<32x1xf32>
    %122 = arith.divf %120, %121 : vector<32x1xf32>
    %123 = vector.broadcast %115 : vector<32x1xf32> to vector<32x32xf32>
    %124 = arith.subf %109, %123 : vector<32x32xf32>
    %cst_57 = arith.constant 9.99999974E-6 : f32
    %125 = vector.broadcast %cst_57 : f32 to vector<32x1xf32>
    %126 = arith.addf %122, %125 : vector<32x1xf32>
    %127 = math.rsqrt %126 : vector<32x1xf32>
    %128 = vector.broadcast %127 : vector<32x1xf32> to vector<32x32xf32>
    %129 = arith.mulf %124, %128 : vector<32x32xf32>
    %130 = vector.broadcast %110 : vector<1x32xf32> to vector<32x32xf32>
    %131 = arith.mulf %129, %130 : vector<32x32xf32>
    %132 = vector.broadcast %111 : vector<1x32xf32> to vector<32x32xf32>
    %133 = arith.addf %131, %132 : vector<32x32xf32>
    %134 = vector.shape_cast %133 : vector<32x32xf32> to vector<4x8x32xf32>
    %135 = vector.extract_strided_slice %134 {offsets = [0, 0, 0], sizes = [4, 1, 32], strides = [1, 1, 1]} : vector<4x8x32xf32> to vector<4x1x32xf32>
    %136 = vector.shape_cast %135 : vector<4x1x32xf32> to vector<4x32xf32>
    %137 = arith.truncf %136 : vector<4x32xf32> to vector<4x32xbf16>
    %c0_58 = arith.constant 0 : index
    %c0_59 = arith.constant 0 : index
    %138 = vector.load %arg17[%c0_58, %c0_59] : memref<32x32xbf16, #tpu.memory_space<vmem>>, vector<32x32xbf16>
    %cst_60 = arith.constant dense<0.000000e+00> : vector<4x32xf32>
    %139 = tpu.matmul %137, %138, %cst_60 {dimension_numbers = #tpu.dot_dimension_numbers<[1], [0], [0], [1], [0, 0, 1, 1], [], []>} : vector<4x32xbf16>, vector<32x32xbf16>, vector<4x32xf32> -> vector<4x32xf32>
    %c0_61 = arith.constant 0 : index
    %c0_62 = arith.constant 0 : index
    %140 = vector.load %arg18[%c0_61, %c0_62] : memref<1x32xf32, #tpu.memory_space<vmem>>, vector<1x32xf32>
    %141 = vector.broadcast %140 : vector<1x32xf32> to vector<4x32xf32>
    %142 = arith.addf %139, %141 : vector<4x32xf32>
    %143 = math.tanh %142 : vector<4x32xf32>
    %c0_63 = arith.constant 0 : index
    %c0_64 = arith.constant 0 : index
    %144 = vector.load %arg19[%c0_63, %c0_64] : memref<4x32xf32, #tpu.memory_space<vmem>>, vector<4x32xf32>
    tpu.vector_store %arg19[%c0_63, %c0_64], %143 {strides = array<i32>} : memref<4x32xf32, #tpu.memory_space<vmem>>, vector<4x32xf32>,
    return
  }
  func.func @transform_0(%arg0: i32) -> (i32, i32) {
    %c0_i32 = arith.constant 0 : i32
    %c0_i32_0 = arith.constant 0 : i32
    return %arg0, %c0_i32 : i32, i32
  }
  func.func @transform_1(%arg0: i32) -> (i32, i32, i32) {
    %c0_i32 = arith.constant 0 : i32
    %c0_i32_0 = arith.constant 0 : i32
    %c0_i32_1 = arith.constant 0 : i32
    return %arg0, %c0_i32, %c0_i32_0 : i32, i32, i32
  }
  func.func @transform_2(%arg0: i32) -> (i32, i32) {
    %c0_i32 = arith.constant 0 : i32
    %c0_i32_0 = arith.constant 0 : i32
    %c0_i32_1 = arith.constant 0 : i32
    return %c0_i32, %c0_i32_0 : i32, i32
  }
  func.func @transform_3(%arg0: i32) -> (i32, i32) {
    %c0_i32 = arith.constant 0 : i32
    %c0_i32_0 = arith.constant 0 : i32
    %c0_i32_1 = arith.constant 0 : i32
    return %c0_i32, %c0_i32_0 : i32, i32
  }
  func.func @transform_4(%arg0: i32) -> (i32, i32) {
    %c0_i32 = arith.constant 0 : i32
    %c0_i32_0 = arith.constant 0 : i32
    %c0_i32_1 = arith.constant 0 : i32
    return %c0_i32, %c0_i32_0 : i32, i32
  }
  func.func @transform_5(%arg0: i32) -> (i32, i32) {
    %c0_i32 = arith.constant 0 : i32
    %c0_i32_0 = arith.constant 0 : i32
    %c0_i32_1 = arith.constant 0 : i32
    return %c0_i32, %c0_i32_0 : i32, i32
  }
  func.func @transform_6(%arg0: i32) -> (i32, i32) {
    %c0_i32 = arith.constant 0 : i32
    %c0_i32_0 = arith.constant 0 : i32
    %c0_i32_1 = arith.constant 0 : i32
    return %c0_i32, %c0_i32_0 : i32, i32
  }
  func.func @transform_7(%arg0: i32) -> (i32, i32) {
    %c0_i32 = arith.constant 0 : i32
    %c0_i32_0 = arith.constant 0 : i32
    %c0_i32_1 = arith.constant 0 : i32
    return %c0_i32, %c0_i32_0 : i32, i32
  }
  func.func @transform_8(%arg0: i32) -> (i32, i32) {
    %c0_i32 = arith.constant 0 : i32
    %c0_i32_0 = arith.constant 0 : i32
    %c0_i32_1 = arith.constant 0 : i32
    return %c0_i32, %c0_i32_0 : i32, i32
  }
  func.func @transform_9(%arg0: i32) -> (i32, i32) {
    %c0_i32 = arith.constant 0 : i32
    %c0_i32_0 = arith.constant 0 : i32
    %c0_i32_1 = arith.constant 0 : i32
    return %c0_i32, %c0_i32_0 : i32, i32
  }
  func.func @transform_10(%arg0: i32) -> (i32, i32) {
    %c0_i32 = arith.constant 0 : i32
    %c0_i32_0 = arith.constant 0 : i32
    %c0_i32_1 = arith.constant 0 : i32
    return %c0_i32, %c0_i32_0 : i32, i32
  }
  func.func @transform_11(%arg0: i32) -> (i32, i32) {
    %c0_i32 = arith.constant 0 : i32
    %c0_i32_0 = arith.constant 0 : i32
    %c0_i32_1 = arith.constant 0 : i32
    return %c0_i32, %c0_i32_0 : i32, i32
  }
  func.func @transform_12(%arg0: i32) -> (i32, i32) {
    %c0_i32 = arith.constant 0 : i32
    %c0_i32_0 = arith.constant 0 : i32
    %c0_i32_1 = arith.constant 0 : i32
    return %c0_i32, %c0_i32_0 : i32, i32
  }
  func.func @transform_13(%arg0: i32) -> (i32, i32) {
    %c0_i32 = arith.constant 0 : i32
    %c0_i32_0 = arith.constant 0 : i32
    %c0_i32_1 = arith.constant 0 : i32
    return %c0_i32, %c0_i32_0 : i32, i32
  }
  func.func @transform_14(%arg0: i32) -> (i32, i32) {
    %c0_i32 = arith.constant 0 : i32
    %c0_i32_0 = arith.constant 0 : i32
    %c0_i32_1 = arith.constant 0 : i32
    return %c0_i32, %c0_i32_0 : i32, i32
  }
  func.func @transform_15(%arg0: i32) -> (i32, i32) {
    %c0_i32 = arith.constant 0 : i32
    %c0_i32_0 = arith.constant 0 : i32
    %c0_i32_1 = arith.constant 0 : i32
    return %c0_i32, %c0_i32_0 : i32, i32
  }
  func.func @transform_16(%arg0: i32) -> (i32, i32) {
    %c0_i32 = arith.constant 0 : i32
    %c0_i32_0 = arith.constant 0 : i32
    %c0_i32_1 = arith.constant 0 : i32
    return %c0_i32, %c0_i32_0 : i32, i32
  }
  func.func @transform_17(%arg0: i32) -> (i32, i32) {
    %c0_i32 = arith.constant 0 : i32
    %c0_i32_0 = arith.constant 0 : i32
    %c0_i32_1 = arith.constant 0 : i32
    return %c0_i32, %c0_i32_0 : i32, i32
  }
  func.func @transform_18(%arg0: i32) -> (i32, i32) {
    %c0_i32 = arith.constant 0 : i32
    %c0_i32_0 = arith.constant 0 : i32
    return %arg0, %c0_i32 : i32, i32
  }
}

</mosaic_0001>

<bundles_post_ra>
// kernel: model_forward.1
= control target key start
LH: loop header
LB: loop body
LE: loop exit
PB: predicated region body
PF: predicated region fallthrough
CT: control target
= control target key end

     0   :  { %vm66_vm0 = vcmask 261120   ;;  %s1137_s19 = smov 96   ;;  %vm715_vm1 = vcmask 523264   ;;  %vm1140_vm2 = vmmov 0   ;;  %vm873_vm3 = vcmask 1041409   ;;  %s1421_s0 = inlined_call_operand.vmem [shape: f32[32,32], index: 0, kind: input, shape index: {}]   ;;  %s1422_s4 = inlined_call_operand.vmem [shape: bf16[32,96], index: 4, kind: input, shape index: {}]   ;;  %s1423_s2 = inlined_call_operand.vmem [shape: f32[1,32], index: 2, kind: input, shape index: {}]   ;;  %s1424_s3 = inlined_call_operand.vmem [shape: f32[1,32], index: 3, kind: input, shape index: {}]   ;;  %s1425_s5 = inlined_call_operand.vmem [shape: f32[1,96], index: 5, kind: input, shape index: {}]   ;;  %s1426_s1 = inlined_call_operand.vmem [shape: f32[1,32,32], index: 1, kind: input, shape index: {}]   ;;  %s1427_s6 = inlined_call_operand.vmem [shape: bf16[32,32], index: 6, kind: input, shape index: {}]   ;;  %s1428_s7 = inlined_call_operand.vmem [shape: f32[1,32], index: 7, kind: input, shape index: {}]   ;;  %s1429_s10 = inlined_call_operand.vmem [shape: bf16[32,64], index: 10, kind: input, shape index: {}]   ;;  %s1430_s8 = inlined_call_operand.vmem [shape: f32[1,32], index: 8, kind: input, shape index: {}]   ;;  %s1431_s9 = inlined_call_operand.vmem [shape: f32[1,32], index: 9, kind: input, shape index: {}]   ;;  %s1432_s12 = inlined_call_operand.vmem [shape: bf16[64,32], index: 12, kind: input, shape index: {}]   ;;  %s1433_s11 = inlined_call_operand.vmem [shape: f32[1,64], index: 11, kind: input, shape index: {}]   ;;  %s1434_s13 = inlined_call_operand.vmem [shape: f32[1,32], index: 13, kind: input, shape index: {}]   ;;  %s1435_s16 = inlined_call_operand.vmem [shape: bf16[32,32], index: 16, kind: input, shape index: {}]   ;;  %s1436_s14 = inlined_call_operand.vmem [shape: f32[1,32], index: 14, kind: input, shape index: {}]   ;;  %s1437_s15 = inlined_call_operand.vmem [shape: f32[1,32], index: 15, kind: input, shape index: {}]   ;;  %s1438_s17 = inlined_call_operand.vmem [shape: f32[1,32], index: 17, kind: input, shape index: {}]   ;;  %s1439_s18 = inlined_call_operand.vmem [shape: f32[4,32], index: 18, kind: output, shape index: {}]  }
   0x1   :  { %1442 = sst [smem:[#allocation2_spill]] %s1421_s0  ;;  %v945_v50 = vld [vmem:[%s1424_s3] ss:$0 sm:$0xff]  ;;  %vm876_vm4 = vcmask 1042434   ;;  %vm879_vm5 = vcmask 1043459   ;;  %vm938_vm6 = vcmask 257024  }
   0x2   :  { %1443 = sst [smem:[#allocation3_spill]] %s1422_s4  ;;  %s1445_s29 = sld [smem:[#allocation2_spill]]  ;;  %v946_v63 = vld [vmem:[%s1425_s5] ss:$0 sm:$0xff] }
   0x3   :  { %1444 = sst [smem:[#allocation4_spill]] %s1423_s2  ;;  %s1446_s23 = sld [smem:[#allocation3_spill]] }
   0x4   :  { %s1447_s28 = sld [smem:[#allocation4_spill]] }
   0x8   :  { %v60_v0 = vld [vmem:[%s1445_s29] sm:$0xff]  ;;  %v62_v1 = vld [vmem:[%s1445_s29 + $0x10] sm:$0xff]  ;;  %v61_v2 = vld [vmem:[%s1445_s29 + $0x8] sm:$0xff] }
   0x9   :  { %v67_v3 = vsel %vm66_vm0, %v60_v0, 0.0  ;;  %v73_v4 = vsel %vm66_vm0, %v62_v1, 0.0  ;;  %v63_v5 = vld [vmem:[%s1445_s29 + $0x18] sm:$0xff]  ;;  %v70_v6 = vsel %vm66_vm0, %v61_v2, 0.0  ;;  %v1075_v28 = vld [vmem:[%s1446_s23] sm:$0xff]   ;;  %v1076_v29 = vld [vmem:[%s1446_s23 + $0x8] sm:$0xff]  }
   0xa   :  { %68 = vadd.xlane.f32.xlu0 %v67_v3  ;;  %74 = vadd.xlane.f32.xlu1 %v73_v4  ;;  %v76_v7 = vsel %vm66_vm0, %v63_v5, 0.0  ;;  %v944_v44 = vld [vmem:[%s1447_s28] ss:$0 sm:$0xff] }
   0xb   :  { %1009 = vmatprep.subr.bf16.mxu0 %v1075_v28 }
   0xc   :  { %1010 = vmatpush3.bf16.msra.mxu0 %v1075_v28 }
   0xd   :  { %1011 = vmatprep.subr.bf16.mxu0 %v1076_v29 }
   0xe   :  { %71 = vadd.xlane.f32.xlu0 %v70_v6  ;;  %77 = vadd.xlane.f32.xlu1 %v76_v7 }
  0x10   :  { %1012 = vmatpush3.bf16.msra.mxu0 %v1076_v29 }
  0x97   :  { %v69_v8 = vpop.xlane.xlu0 %68  ;;  %v75_v9 = vpop.xlane.xlu1 %74 }
  0x98   :  { %v80_v10 = vmul.f32 0.03125, %v69_v8  ;;  %v82_v11 = vmul.f32 0.03125, %v75_v9 }
  0x9a   :  { %v84_v12 = vsub.f32 %v60_v0, %v80_v10  ;;  %v86_v13 = vsub.f32 %v62_v1, %v82_v11 }
  0x9b   :  { %v72_v14 = vpop.xlane.xlu0 %71  ;;  %v78_v15 = vpop.xlane.xlu1 %77 }
  0x9c   :  { %v81_v16 = vmul.f32 0.03125, %v72_v14  ;;  %v83_v17 = vmul.f32 0.03125, %v78_v15  ;;  %v88_v18 = vmul.f32 %v84_v12, %v84_v12  ;;  %v90_v19 = vmul.f32 %v86_v13, %v86_v13 }
  0x9e   :  { %v85_v20 = vsub.f32 %v61_v2, %v81_v16  ;;  %v87_v21 = vsub.f32 %v63_v5, %v83_v17  ;;  %v92_v22 = vsel %vm66_vm0, %v88_v18, 0.0  ;;  %v98_v23 = vsel %vm66_vm0, %v90_v19, 0.0  ;;  %v225_v16 = vld [vmem:[%s1426_s1 + $0x18] sm:$0xff]  ;;  %v223_v17 = vld [vmem:[%s1426_s1 + $0x8] sm:$0xff] }
  0x9f   :  { %93 = vadd.xlane.f32.xlu0 %v92_v22 }
  0xa0   :  { %v89_v24 = vmul.f32 %v85_v20, %v85_v20  ;;  %v91_v25 = vmul.f32 %v87_v21, %v87_v21 }
  0xa2   :  { %v95_v26 = vsel %vm66_vm0, %v89_v24, 0.0  ;;  %v101_v27 = vsel %vm66_vm0, %v91_v25, 0.0 }
  0xa3   :  { %99 = vadd.xlane.f32.xlu0 %v98_v23  ;;  %96 = vadd.xlane.f32.xlu1 %v95_v26 }
  0xa7   :  { %102 = vadd.xlane.f32.xlu1 %v101_v27 }
 0x12c   :  { %v94_v30 = vpop.xlane.xlu0 %93 }
 0x12d   :  { %v104_v31 = vmul.f32 0.03125, %v94_v30 }
 0x12f   :  { %v108_v32 = vadd.f32 1e-05, %v104_v31 }
 0x130   :  { %v97_v33 = vpop.xlane.xlu1 %96  ;;  %v100_v34 = vpop.xlane.xlu0 %99 }
 0x131   :  { %1087 = vrsqrt.f32 %v108_v32  ;;  %v105_v35 = vmul.f32 0.03125, %v97_v33  ;;  %v106_v36 = vmul.f32 0.03125, %v100_v34 }
 0x133   :  { %v109_v37 = vadd.f32 1e-05, %v105_v35  ;;  %v110_v38 = vadd.f32 1e-05, %v106_v36 }
 0x134   :  { %v103_v39 = vpop.xlane.xlu1 %102 }
 0x135   :  { %1089 = vrsqrt.f32 %v109_v37  ;;  %v107_v40 = vmul.f32 0.03125, %v103_v39 }
 0x136   :  { %1091 = vrsqrt.f32 %v110_v38 }
 0x137   :  { %v111_v41 = vadd.f32 1e-05, %v107_v40 }
 0x139   :  { %1093 = vrsqrt.f32 %v111_v41 }
 0x13b   :  { %v1088_v42 = vpop.eup %1087 }
 0x13c   :  { %v116_v43 = vmul.f32 %v1088_v42, %v84_v12 }
 0x13e   :  { %v126_v48 = vmul.f32 %v944_v44, %v116_v43 }
 0x13f   :  { %v1090_v45 = vpop.eup %1089 }
 0x140   :  { %v1092_v46 = vpop.eup %1091  ;;  %v117_v47 = vmul.f32 %v1090_v45, %v85_v20  ;;  %v1268_v54 = vadd.f32 %v945_v50, %v126_v48  ;;  %v224_v20 = vld [vmem:[%s1426_s1 + $0x10] sm:$0xff] }
 0x141   :  { %v118_v49 = vmul.f32 %v1092_v46, %v86_v13  ;;  %v222_v13 = vld [vmem:[%s1426_s1] sm:$0xff]  ;;  %s1138_s1 = smov 64  }
 0x142   :  { %v127_v51 = vmul.f32 %v944_v44, %v117_v47 }
 0x143   :  { %v1094_v52 = vpop.eup %1093  ;;  %v128_v56 = vmul.f32 %v944_v44, %v118_v49 }
 0x144   :  { %v119_v53 = vmul.f32 %v1094_v52, %v87_v21  ;;  %v1270_v55 = vadd.f32 %v945_v50, %v127_v51 }
 0x145   :  { %v1275_v59 = vadd.f32 %v945_v50, %v128_v56 }
 0x146   :  { %v140_v57 = vpack.c.bf16 %v1270_v55, %v1268_v54  ;;  %v129_v58 = vmul.f32 %v944_v44, %v119_v53 }
 0x148   :  { %1013 = vmatprep.mubr.msk.bf16.mxu0 %vm66_vm0, %v140_v57  ;;  %v1277_v60 = vadd.f32 %v945_v50, %v129_v58  ;;  %v1077_v57 = vld [vmem:[%s1427_s6] sm:$0xff]  }
 0x14a   :  { %v141_v61 = vpack.c.bf16 %v1277_v60, %v1275_v59 }
 0x14c   :  { %1014 = vmatmul.mubr.msk.bf16.vlgmr.msra.gmra.mrb[0].mxu0 %vm66_vm0, %v141_v61 }
 0x21f   :  { %v1015_v62 = vpop.f32.mrb[0].mxu0 }
 0x220   :  { %v205_v0 = vpop.f32.mrb[1].mxu0  ;;  %v214_v2 = vadd.f32 %v1015_v62, %v946_v63 }
 0x221   :  { %v1016_v1 = vpop.f32.mrb[2].mxu0  ;;  %v206_v5 = vadd.f32 %v946_v63, %v205_v0 }
 0x222   :  { %v217_v3 = vadd.f32 %v1016_v1, %v946_v63  ;;  %v208_v4 = vpop.f32.mrb[3].mxu0 }
 0x223   :  { %v209_v6 = vadd.f32 %v946_v63, %v208_v4 }
 0x224   :  { %v1285_v7 = vpack.c.bf16 %v217_v3, %v214_v2 }
 0x225   :  { %v1287_v8 = vpack.c.bf16 %v209_v6, %v206_v5  ;;  %v1078_v6 = vld [vmem:[%s1427_s6 + $0x8] sm:$0xff]  }
 0x226   :  { %230 = vrot.lane.b32.xlu1 %v1285_v7, %s1137_s19 }
 0x227   :  { %228 = vrot.lane.b32.xlu0 %v1287_v8, %s1137_s19  ;;  %1021 = vmatprep.mubr.msk.bf16.mxu1 %vm66_vm0, %v1287_v8 }
 0x298   :  { %v231_v11 = vpop.permute.xlu1 %230 }
 0x299   :  { %v229_v9 = vpop.permute.xlu0 %228  ;;  %v242_v12 = vsel %vm66_vm0, %v231_v11, 0 }
 0x29a   :  { %1069 = vmatprep.subr.msk.bf16.mxu1 %vm66_vm0, %v229_v9  ;;  %v239_v10 = vsel %vm66_vm0, %v229_v9, 0 }
 0x29b   :  { %1018 = vmatpush3.bf16.xpose.msra.mxu1 %v239_v10 }
 0x29c   :  { %1070 = vmatprep.subr.msk.bf16.mxu1 %vm66_vm0, %v231_v11 }
 0x2a3   :  { %1020 = vmatpush3.bf16.xpose.msra.mxu1 %v242_v12 }
 0x2aa   :  { %1022 = vmatmul.mubr.msk.bf16.vlgmr.msra.gmra.mrb[0].mxu1 %vm66_vm0, %v1285_v7 }
 0x37d   :  { %v1023_v14 = vpop.f32.mrb[0].mxu1 }
 0x37e   :  { %v278_v15 = vpop.f32.mrb[1].mxu1  ;;  %v287_v25 = vadd.f32 %v1023_v14, %v224_v20 }
 0x37f   :  { %v279_v18 = vadd.f32 %v278_v15, %v222_v13  ;;  %v1024_v19 = vpop.f32.mrb[2].mxu1  ;;  %v955_v13 = vld [vmem:[%s1428_s7] ss:$0 sm:$0xff] }
 0x380   :  { %v281_v21 = vpop.f32.mrb[3].mxu1  ;;  %v290_v22 = vadd.f32 %v1024_v19, %v225_v16  ;;  %v299_v28 = vsel %vm66_vm0, %v287_v25, -inf }
 0x381   :  { %v282_v23 = vadd.f32 %v281_v21, %v223_v17  ;;  %v293_v24 = vsel %vm66_vm0, %v279_v18, -inf }
 0x382   :  { %294 = vmax.xlane.f32.xlu1 %v293_v24  ;;  %v302_v27 = vsel %vm66_vm0, %v290_v22, -inf }
 0x383   :  { %v296_v26 = vsel %vm66_vm0, %v282_v23, -inf }
 0x384   :  { %297 = vmax.xlane.f32.xlu0 %v296_v26 }
 0x386   :  { %303 = vmax.xlane.f32.xlu1 %v302_v27 }
 0x388   :  { %300 = vmax.xlane.f32.xlu0 %v299_v28 }
 0x40f   :  { %v295_v29 = vpop.xlane.xlu1 %294 }
 0x410   :  { %v305_v33 = vsub.f32 %v279_v18, %v295_v29 }
 0x411   :  { %v298_v30 = vpop.xlane.xlu0 %297 }
 0x412   :  { %v306_v31 = vsub.f32 %v282_v23, %v298_v30  ;;  %v309_v39 = vmul.f32 1.442695, %v305_v33 }
 0x413   :  { %v304_v32 = vpop.xlane.xlu1 %303 }
 0x414   :  { %v308_v34 = vsub.f32 %v290_v22, %v304_v32  ;;  %v311_v35 = vmul.f32 1.442695, %v306_v31 }
 0x415   :  { %v301_v36 = vpop.xlane.xlu0 %300 }
 0x416   :  { %v315_v37 = vmul.f32 1.442695, %v308_v34  ;;  %v307_v38 = vsub.f32 %v287_v25, %v301_v36 }
 0x418   :  { %1095 = vpow2.f32 %v315_v37  ;;  %v313_v40 = vmul.f32 1.442695, %v307_v38 }
 0x419   :  { %1097 = vpow2.f32 %v311_v35 }
 0x41a   :  { %1099 = vpow2.f32 %v313_v40 }
 0x41b   :  { %1101 = vpow2.f32 %v309_v39 }
 0x422   :  { %v1096_v41 = vpop.eup %1095 }
 0x423   :  { %v1098_v42 = vpop.eup %1097  ;;  %v326_v43 = vsel %vm66_vm0, %v1096_v41, 0.0 }
 0x424   :  { %v1100_v44 = vpop.eup %1099  ;;  %327 = vadd.xlane.f32.xlu1 %v326_v43  ;;  %v320_v47 = vsel %vm66_vm0, %v1098_v42, 0.0 }
 0x425   :  { %v323_v45 = vsel %vm66_vm0, %v1100_v44, 0.0  ;;  %v1102_v46 = vpop.eup %1101 }
 0x426   :  { %324 = vadd.xlane.f32.xlu0 %v323_v45  ;;  %v317_v48 = vsel %vm66_vm0, %v1102_v46, 0.0 }
 0x428   :  { %321 = vadd.xlane.f32.xlu1 %v320_v47  ;;  %v1080_v47 = vld [vmem:[%s1429_s10 + $0x8] sm:$0xff]  }
 0x42a   :  { %318 = vadd.xlane.f32.xlu0 %v317_v48 }
 0x439   :  { %341 = vrot.lane.b32.xlu1 %v1285_v7, %s1138_s1 }
 0x440   :  { %339 = vrot.lane.b32.xlu0 %v1287_v8, %s1138_s1 }
 0x4b1   :  { %v328_v49 = vpop.xlane.xlu1 %327 }
 0x4b3   :  { %v325_v50 = vpop.xlane.xlu0 %324 }
 0x4b4   :  { %1103 = vrcp.f32 %v325_v50 }
 0x4b5   :  { %v322_v51 = vpop.xlane.xlu1 %321 }
 0x4b6   :  { %1105 = vrcp.f32 %v322_v51 }
 0x4b7   :  { %1107 = vrcp.f32 %v328_v49  ;;  %v319_v52 = vpop.xlane.xlu0 %318 }
 0x4b8   :  { %1109 = vrcp.f32 %v319_v52 }
 0x4b9   :  { %v342_v56 = vpop.permute.xlu1 %341 }
 0x4bb   :  { %v340_v53 = vpop.permute.xlu0 %339 }
 0x4bc   :  { %1025 = vmatprep.subr.bf16.mxu0 %v340_v53 }
 0x4bd   :  { %1026 = vmatpush3.bf16.msra.mxu0 %v340_v53 }
 0x4be   :  { %1027 = vmatprep.subr.bf16.mxu0 %v342_v56  ;;  %v1104_v58 = vpop.eup %1103 }
 0x4bf   :  { %v335_v0 = vmul.f32 %v1104_v58, %v1100_v44 }
 0x4c0   :  { %v1106_v61 = vpop.eup %1105 }
 0x4c1   :  { %v1108_v62 = vpop.eup %1107  ;;  %1028 = vmatpush3.bf16.msra.mxu0 %v342_v56  ;;  %v334_v2 = vmul.f32 %v1106_v61, %v1098_v42 }
 0x4c2   :  { %v1110_v63 = vpop.eup %1109  ;;  %1033 = vmatprep.subr.bf16.mxu0 %v1077_v57  ;;  %v336_v3 = vmul.f32 %v1108_v62, %v1096_v41 }
 0x4c3   :  { %v333_v1 = vmul.f32 %v1110_v63, %v1102_v46  ;;  %v1079_v46 = vld [vmem:[%s1429_s10] sm:$0xff]  }
 0x4c4   :  { %v338_v5 = vpack.c.bf16 %v336_v3, %v335_v0  ;;  %1041 = vmatprep.subr.bf16.mxu1 %v1079_v46 }
 0x4c5   :  { %v337_v4 = vpack.c.bf16 %v334_v2, %v333_v1  ;;  %1042 = vmatpush3.bf16.msra.mxu1 %v1079_v46  ;;  %v960_v1 = vld [vmem:[%s1430_s8] ss:$0 sm:$0xff] }
 0x4c6   :  { %1043 = vmatprep.subr.bf16.mxu1 %v1080_v47 }
 0x4c7   :  { %1029 = vmatprep.mubr.msk.bf16.mxu0 %vm66_vm0, %v337_v4 }
 0x4c8   :  { %1030 = vmatmul.mubr.msk.bf16.vlgmr.msra.gmra.mrb[4].mxu0 %vm66_vm0, %v338_v5 }
 0x4c9   :  { %1034 = vmatpush3.bf16.msra.mxu0 %v1077_v57  ;;  %1044 = vmatpush3.bf16.msra.mxu1 %v1080_v47 }
 0x4ca   :  { %1035 = vmatprep.subr.bf16.mxu0 %v1078_v6 }
 0x4cd   :  { %1036 = vmatpush3.bf16.msra.mxu0 %v1078_v6  ;;  %v961_v6 = vld [vmem:[%s1431_s9] ss:$0 sm:$0xff] }
 0x59b   :  { %v1031_v7 = vpop.f32.mrb[4].mxu0 }
 0x59c   :  { %v385_v8 = vpop.f32.mrb[5].mxu0 }
 0x59d   :  { %v1032_v9 = vpop.f32.mrb[6].mxu0 }
 0x59e   :  { %v401_v10 = vpack.c.bf16 %v1032_v9, %v1031_v7  ;;  %v388_v11 = vpop.f32.mrb[7].mxu0 }
 0x59f   :  { %v400_v12 = vpack.c.bf16 %v388_v11, %v385_v8 }
 0x5a1   :  { %1037 = vmatprep.mubr.msk.bf16.mxu0 %vm66_vm0, %v400_v12 }
 0x5a2   :  { %1038 = vmatmul.mubr.msk.bf16.vlgmr.msra.gmra.mrb[8].mxu0 %vm66_vm0, %v401_v10 }
 0x675   :  { %v1039_v14 = vpop.f32.mrb[8].mxu0 }
 0x676   :  { %v465_v15 = vpop.f32.mrb[9].mxu0  ;;  %v474_v20 = vadd.f32 %v1039_v14, %v955_v13 }
 0x677   :  { %v466_v16 = vadd.f32 %v955_v13, %v465_v15  ;;  %v1040_v17 = vpop.f32.mrb[10].mxu0 }
 0x678   :  { %v477_v18 = vadd.f32 %v1040_v17, %v955_v13  ;;  %v468_v19 = vpop.f32.mrb[11].mxu0  ;;  %v482_v27 = vadd.f32 %v474_v20, %v1275_v59  ;;  %v1081_v20 = vld [vmem:[%s1432_s12] sm:$0xff]  }
 0x679   :  { %v469_v21 = vadd.f32 %v955_v13, %v468_v19  ;;  %v480_v22 = vadd.f32 %v466_v16, %v1268_v54  ;;  %1049 = vmatprep.subr.bf16.mxu0 %v1081_v20 }
 0x67a   :  { %v483_v25 = vadd.f32 %v477_v18, %v1277_v60  ;;  %v492_v29 = vsel %vm66_vm0, %v482_v27, 0.0  ;;  %1050 = vmatpush3.bf16.msra.mxu0 %v1081_v20 }
 0x67b   :  { %v486_v23 = vsel %vm66_vm0, %v480_v22, 0.0  ;;  %v481_v24 = vadd.f32 %v469_v21, %v1270_v55  ;;  %v1082_v21 = vld [vmem:[%s1432_s12 + $0x8] sm:$0xff]  }
 0x67c   :  { %487 = vadd.xlane.f32.xlu1 %v486_v23  ;;  %v495_v28 = vsel %vm66_vm0, %v483_v25, 0.0  ;;  %1051 = vmatprep.subr.bf16.mxu0 %v1082_v21  ;;  %v1084_v23 = vld [vmem:[%s1432_s12 + $0x18] sm:$0xff]  }
 0x67d   :  { %v489_v26 = vsel %vm66_vm0, %v481_v24, 0.0 }
 0x67e   :  { %490 = vadd.xlane.f32.xlu0 %v489_v26  ;;  %1052 = vmatpush3.bf16.msra.mxu0 %v1082_v21 }
 0x680   :  { %496 = vadd.xlane.f32.xlu1 %v495_v28 }
 0x682   :  { %493 = vadd.xlane.f32.xlu0 %v492_v29 }
 0x709   :  { %v488_v30 = vpop.xlane.xlu1 %487 }
 0x70a   :  { %v498_v54 = vmul.f32 0.03125, %v488_v30 }
 0x70b   :  { %v491_v31 = vpop.xlane.xlu0 %490 }
 0x70c   :  { %v502_v32 = vsub.f32 %v480_v22, %v498_v54  ;;  %v499_v33 = vmul.f32 0.03125, %v491_v31  ;;  %v1083_v22 = vld [vmem:[%s1432_s12 + $0x10] sm:$0xff]  }
 0x70d   :  { %v497_v55 = vpop.xlane.xlu1 %496  ;;  %1053 = vmatprep.subr.bf16.mxu0 %v1083_v22 }
 0x70e   :  { %v503_v34 = vsub.f32 %v481_v24, %v499_v33  ;;  %v501_v60 = vmul.f32 0.03125, %v497_v55  ;;  %v506_v35 = vmul.f32 %v502_v32, %v502_v32  ;;  %1054 = vmatpush3.bf16.msra.mxu0 %v1083_v22  ;;  %v962_v24 = vld [vmem:[%s1433_s11] ss:$0 sm:$0xff] }
 0x70f   :  { %v494_v36 = vpop.xlane.xlu0 %493  ;;  %1055 = vmatprep.subr.bf16.mxu0 %v1084_v23 }
 0x710   :  { %v505_v37 = vsub.f32 %v483_v25, %v501_v60  ;;  %v500_v38 = vmul.f32 0.03125, %v494_v36  ;;  %v510_v59 = vsel %vm66_vm0, %v506_v35, 0.0  ;;  %v507_v39 = vmul.f32 %v503_v34, %v503_v34 }
 0x711   :  { %511 = vadd.xlane.f32.xlu0 %v510_v59 }
 0x712   :  { %v504_v40 = vsub.f32 %v482_v27, %v500_v38  ;;  %v513_v41 = vsel %vm66_vm0, %v507_v39, 0.0  ;;  %v509_v42 = vmul.f32 %v505_v37, %v505_v37  ;;  %1056 = vmatpush3.bf16.msra.mxu0 %v1084_v23 }
 0x713   :  { %514 = vadd.xlane.f32.xlu1 %v513_v41 }
 0x714   :  { %v508_v43 = vmul.f32 %v504_v40, %v504_v40  ;;  %v519_v45 = vsel %vm66_vm0, %v509_v42, 0.0 }
 0x716   :  { %v516_v44 = vsel %vm66_vm0, %v508_v43, 0.0 }
 0x717   :  { %517 = vadd.xlane.f32.xlu0 %v516_v44  ;;  %520 = vadd.xlane.f32.xlu1 %v519_v45 }
 0x79e   :  { %v512_v48 = vpop.xlane.xlu0 %511 }
 0x79f   :  { %v522_v49 = vmul.f32 0.03125, %v512_v48 }
 0x7a0   :  { %v515_v50 = vpop.xlane.xlu1 %514 }
 0x7a1   :  { %v526_v51 = vadd.f32 1e-05, %v522_v49  ;;  %v523_v52 = vmul.f32 0.03125, %v515_v50 }
 0x7a3   :  { %1111 = vrsqrt.f32 %v526_v51  ;;  %v527_v53 = vadd.f32 1e-05, %v523_v52 }
 0x7a4   :  { %v518_v56 = vpop.xlane.xlu0 %517  ;;  %v521_v57 = vpop.xlane.xlu1 %520 }
 0x7a5   :  { %1113 = vrsqrt.f32 %v527_v53  ;;  %v524_v58 = vmul.f32 0.03125, %v518_v56  ;;  %v525_v61 = vmul.f32 0.03125, %v521_v57 }
 0x7a7   :  { %v528_v62 = vadd.f32 1e-05, %v524_v58  ;;  %v529_v63 = vadd.f32 1e-05, %v525_v61 }
 0x7a9   :  { %1115 = vrsqrt.f32 %v528_v62 }
 0x7aa   :  { %1117 = vrsqrt.f32 %v529_v63 }
 0x7ad   :  { %v1112_v0 = vpop.eup %1111 }
 0x7ae   :  { %v534_v2 = vmul.f32 %v1112_v0, %v502_v32 }
 0x7af   :  { %v1114_v3 = vpop.eup %1113 }
 0x7b0   :  { %v535_v4 = vmul.f32 %v1114_v3, %v503_v34  ;;  %v544_v5 = vmul.f32 %v960_v1, %v534_v2 }
 0x7b2   :  { %v545_v7 = vmul.f32 %v960_v1, %v535_v4  ;;  %v1358_v11 = vadd.f32 %v961_v6, %v544_v5 }
 0x7b3   :  { %v1116_v8 = vpop.eup %1115 }
 0x7b4   :  { %v1118_v9 = vpop.eup %1117  ;;  %v536_v10 = vmul.f32 %v1116_v8, %v504_v40  ;;  %v1360_v12 = vadd.f32 %v961_v6, %v545_v7  ;;  %v967_v7 = vld [vmem:[%s1434_s13] ss:$0 sm:$0xff] }
 0x7b5   :  { %v537_v13 = vmul.f32 %v1118_v9, %v505_v37 }
 0x7b6   :  { %v546_v14 = vmul.f32 %v960_v1, %v536_v10  ;;  %v558_v15 = vpack.c.bf16 %v1360_v12, %v1358_v11 }
 0x7b7   :  { %v547_v16 = vmul.f32 %v960_v1, %v537_v13 }
 0x7b8   :  { %1045 = vmatprep.mubr.msk.bf16.mxu1 %vm66_vm0, %v558_v15  ;;  %v1365_v17 = vadd.f32 %v961_v6, %v546_v14 }
 0x7b9   :  { %v1367_v18 = vadd.f32 %v961_v6, %v547_v16 }
 0x7bb   :  { %v559_v19 = vpack.c.bf16 %v1367_v18, %v1365_v17 }
 0x7bd   :  { %1046 = vmatmul.mubr.msk.bf16.vlgmr.msra.gmra.mrb[4].mxu1 %vm66_vm0, %v559_v19 }
 0x890   :  { %v1047_v25 = vpop.f32.mrb[4].mxu1 }
 0x891   :  { %v632_v26 = vadd.f32 %v1047_v25, %v962_v24  ;;  %v623_v27 = vpop.f32.mrb[5].mxu1 }
 0x892   :  { %v624_v28 = vadd.f32 %v962_v24, %v623_v27  ;;  %v1048_v29 = vpop.f32.mrb[6].mxu1 }
 0x893   :  { %v640_v30 = vmul.f32 %v632_v26, %v632_v26  ;;  %v635_v54 = vadd.f32 %v1048_v29, %v962_v24  ;;  %v626_v31 = vpop.f32.mrb[7].mxu1 }
 0x894   :  { %v638_v32 = vmul.f32 %v624_v28, %v624_v28  ;;  %v627_v33 = vadd.f32 %v962_v24, %v626_v31 }
 0x895   :  { %v644_v55 = vmul.f32 %v640_v30, %v632_v26  ;;  %v641_v34 = vmul.f32 %v635_v54, %v635_v54 }
 0x896   :  { %v642_v60 = vmul.f32 %v638_v32, %v624_v28  ;;  %v639_v35 = vmul.f32 %v627_v33, %v627_v33 }
 0x897   :  { %v648_v36 = vmul.f32 0.044715, %v644_v55  ;;  %v645_v37 = vmul.f32 %v641_v34, %v635_v54 }
 0x898   :  { %v646_v38 = vmul.f32 0.044715, %v642_v60  ;;  %v643_v59 = vmul.f32 %v639_v35, %v627_v33 }
 0x899   :  { %v652_v39 = vadd.f32 %v648_v36, %v632_v26  ;;  %v649_v40 = vmul.f32 0.044715, %v645_v37 }
 0x89a   :  { %v650_v41 = vadd.f32 %v646_v38, %v624_v28  ;;  %v647_v42 = vmul.f32 0.044715, %v643_v59 }
 0x89b   :  { %v656_v43 = vmul.f32 0.7978846, %v652_v39  ;;  %v653_v44 = vadd.f32 %v649_v40, %v635_v54  ;;  %v1085_v40 = vld [vmem:[%s1435_s16] sm:$0xff]  }
 0x89c   :  { %v654_v45 = vmul.f32 0.7978846, %v650_v41  ;;  %v651_v46 = vadd.f32 %v647_v42, %v627_v33  ;;  %v1139_v41 = vmov 0.0   ;;  %v1086_v42 = vld [vmem:[%s1435_s16 + $0x8] sm:$0xff]  }
 0x89d   :  { %1119 = vtanh.f32 %v656_v43  ;;  %v657_v47 = vmul.f32 0.7978846, %v653_v44  ;;  %1061 = vmatprep.subr.bf16.mxu1 %v1139_v41  ;;  %1065 = vmatprep.mubr.msk.bf16.mxu1 %vm1140_vm2, %v1139_v41 }
 0x89e   :  { %1121 = vtanh.f32 %v654_v45  ;;  %v655_v48 = vmul.f32 0.7978846, %v651_v46  ;;  %1062 = vmatpush3.bf16.msra.mxu1 %v1085_v40 }
 0x89f   :  { %1123 = vtanh.f32 %v657_v47  ;;  %1063 = vmatprep.subr.bf16.mxu1 %v1139_v41 }
 0x8a0   :  { %1125 = vtanh.f32 %v655_v48 }
 0x8a2   :  { %1064 = vmatpush3.bf16.msra.mxu1 %v1086_v42 }
 0x8a7   :  { %v1120_v49 = vpop.eup %1119 }
 0x8a8   :  { %v1122_v50 = vpop.eup %1121  ;;  %v664_v51 = vadd.f32 1.0, %v1120_v49 }
 0x8a9   :  { %v1124_v52 = vpop.eup %1123  ;;  %v662_v53 = vadd.f32 1.0, %v1122_v50 }
 0x8aa   :  { %v1126_v56 = vpop.eup %1125  ;;  %v668_v57 = vmul.f32 0.5, %v664_v51  ;;  %v665_v58 = vadd.f32 1.0, %v1124_v52 }
 0x8ab   :  { %v666_v61 = vmul.f32 0.5, %v662_v53  ;;  %v663_v62 = vadd.f32 1.0, %v1126_v56 }
 0x8ac   :  { %v669_v63 = vmul.f32 0.5, %v665_v58  ;;  %v672_v1 = vmul.f32 %v668_v57, %v632_v26  ;;  %v974_v58 = vld [vmem:[%s1436_s14] ss:$0 sm:$0xff] }
 0x8ad   :  { %v667_v0 = vmul.f32 0.5, %v663_v62  ;;  %v670_v3 = vmul.f32 %v666_v61, %v624_v28  ;;  %v975_v62 = vld [vmem:[%s1437_s15] ss:$0 sm:$0xff] }
 0x8ae   :  { %v673_v2 = vmul.f32 %v669_v63, %v635_v54 }
 0x8af   :  { %v671_v4 = vmul.f32 %v667_v0, %v627_v33 }
 0x8b0   :  { %v675_v5 = vpack.c.bf16 %v673_v2, %v672_v1 }
 0x8b1   :  { %v674_v6 = vpack.c.bf16 %v671_v4, %v670_v3 }
 0x8b3   :  { %1057 = vmatprep.mubr.msk.bf16.mxu0 %vm715_vm1, %v674_v6 }
 0x8b4   :  { %1058 = vmatmul.mubr.msk.bf16.vlgmr.msra.gmra.mrb[12].mxu0 %vm715_vm1, %v675_v5 }
 0x987   :  { %v1059_v8 = vpop.f32.mrb[12].mxu0 }
 0x988   :  { %v765_v9 = vadd.f32 %v1059_v8, %v967_v7  ;;  %v756_v10 = vpop.f32.mrb[13].mxu0 }
 0x989   :  { %v1060_v13 = vpop.f32.mrb[14].mxu0  ;;  %v757_v19 = vadd.f32 %v967_v7, %v756_v10 }
 0x98a   :  { %v768_v14 = vadd.f32 %v1060_v13, %v967_v7  ;;  %v759_v15 = vpop.f32.mrb[15].mxu0  ;;  %v773_v16 = vadd.f32 %v765_v9, %v1365_v17 }
 0x98b   :  { %v760_v20 = vadd.f32 %v967_v7, %v759_v15  ;;  %v771_v25 = vadd.f32 %v757_v19, %v1358_v11 }
 0x98c   :  { %v783_v21 = vsel %vm66_vm0, %v773_v16, 0.0  ;;  %v774_v22 = vadd.f32 %v768_v14, %v1367_v18 }
 0x98d   :  { %784 = vadd.xlane.f32.xlu1 %v783_v21  ;;  %v772_v23 = vadd.f32 %v760_v20, %v1360_v12  ;;  %v777_v27 = vsel %vm66_vm0, %v771_v25, 0.0 }
 0x98e   :  { %v786_v26 = vsel %vm66_vm0, %v774_v22, 0.0 }
 0x98f   :  { %v780_v24 = vsel %vm66_vm0, %v772_v23, 0.0 }
 0x990   :  { %781 = vadd.xlane.f32.xlu0 %v780_v24 }
 0x991   :  { %787 = vadd.xlane.f32.xlu1 %v786_v26 }
 0x994   :  { %778 = vadd.xlane.f32.xlu0 %v777_v27 }
 0xa1a   :  { %v785_v17 = vpop.xlane.xlu1 %784 }
 0xa1b   :  { %v791_v28 = vmul.f32 0.03125, %v785_v17 }
 0xa1d   :  { %v795_v29 = vsub.f32 %v773_v16, %v791_v28  ;;  %v782_v30 = vpop.xlane.xlu0 %781 }
 0xa1e   :  { %v790_v54 = vmul.f32 0.03125, %v782_v30  ;;  %v788_v18 = vpop.xlane.xlu1 %787 }
 0xa1f   :  { %v792_v31 = vmul.f32 0.03125, %v788_v18  ;;  %v799_v32 = vmul.f32 %v795_v29, %v795_v29 }
 0xa20   :  { %v794_v12 = vsub.f32 %v772_v23, %v790_v54  ;;  %v976_v54 = vld [vmem:[%s1438_s17] ss:$0 sm:$0xff] }
 0xa21   :  { %v796_v33 = vsub.f32 %v774_v22, %v792_v31  ;;  %v779_v55 = vpop.xlane.xlu0 %778  ;;  %v807_v11 = vsel %vm66_vm0, %v799_v32, 0.0 }
 0xa22   :  { %v789_v34 = vmul.f32 0.03125, %v779_v55  ;;  %808 = vadd.xlane.f32.xlu1 %v807_v11  ;;  %v798_v60 = vmul.f32 %v794_v12, %v794_v12 }
 0xa23   :  { %v800_v35 = vmul.f32 %v796_v33, %v796_v33 }
 0xa24   :  { %v793_v36 = vsub.f32 %v771_v25, %v789_v34  ;;  %v804_v37 = vsel %vm66_vm0, %v798_v60, 0.0 }
 0xa25   :  { %805 = vadd.xlane.f32.xlu0 %v804_v37  ;;  %v810_v38 = vsel %vm66_vm0, %v800_v35, 0.0 }
 0xa26   :  { %811 = vadd.xlane.f32.xlu1 %v810_v38  ;;  %v797_v59 = vmul.f32 %v793_v36, %v793_v36 }
 0xa28   :  { %v801_v39 = vsel %vm66_vm0, %v797_v59, 0.0 }
 0xa29   :  { %802 = vadd.xlane.f32.xlu0 %v801_v39 }
 0xaaf   :  { %v809_v43 = vpop.xlane.xlu1 %808 }
 0xab0   :  { %v815_v44 = vmul.f32 0.03125, %v809_v43 }
 0xab2   :  { %v819_v45 = vadd.f32 1e-05, %v815_v44  ;;  %v806_v46 = vpop.xlane.xlu0 %805 }
 0xab3   :  { %v814_v47 = vmul.f32 0.03125, %v806_v46  ;;  %v812_v48 = vpop.xlane.xlu1 %811 }
 0xab4   :  { %1127 = vrsqrt.f32 %v819_v45  ;;  %v816_v49 = vmul.f32 0.03125, %v812_v48 }
 0xab5   :  { %v818_v50 = vadd.f32 1e-05, %v814_v47 }
 0xab6   :  { %v820_v51 = vadd.f32 1e-05, %v816_v49  ;;  %v803_v52 = vpop.xlane.xlu0 %802 }
 0xab7   :  { %1129 = vrsqrt.f32 %v818_v50  ;;  %v813_v53 = vmul.f32 0.03125, %v803_v52 }
 0xab8   :  { %1131 = vrsqrt.f32 %v820_v51 }
 0xab9   :  { %v817_v56 = vadd.f32 1e-05, %v813_v53 }
 0xabb   :  { %1133 = vrsqrt.f32 %v817_v56 }
 0xabe   :  { %v1128_v57 = vpop.eup %1127 }
 0xabf   :  { %v827_v61 = vmul.f32 %v1128_v57, %v795_v29 }
 0xac1   :  { %v1130_v63 = vpop.eup %1129  ;;  %v837_v0 = vmul.f32 %v974_v58, %v827_v61 }
 0xac2   :  { %v1132_v1 = vpop.eup %1131  ;;  %v826_v2 = vmul.f32 %v1130_v63, %v794_v12 }
 0xac3   :  { %v847_v3 = vadd.f32 %v975_v62, %v837_v0  ;;  %v828_v4 = vmul.f32 %v1132_v1, %v796_v33 }
 0xac4   :  { %v836_v5 = vmul.f32 %v974_v58, %v826_v2 }
 0xac5   :  { %v1134_v6 = vpop.eup %1133  ;;  %v838_v7 = vmul.f32 %v974_v58, %v828_v4  ;;  %v851_v10 = vpack.c.bf16 %v847_v3, %v847_v3 }
 0xac6   :  { %v846_v8 = vadd.f32 %v975_v62, %v836_v5  ;;  %v825_v9 = vmul.f32 %v1134_v6, %v793_v36 }
 0xac7   :  { %v848_v13 = vadd.f32 %v975_v62, %v838_v7  ;;  %v870_v21 = vunpack.c.l.b16 %v851_v10 }
 0xac8   :  { %v850_v14 = vpack.c.bf16 %v846_v8, %v846_v8  ;;  %v835_v15 = vmul.f32 %v974_v58, %v825_v9 }
 0xac9   :  { %v852_v16 = vpack.c.bf16 %v848_v13, %v848_v13  ;;  %v875_v26 = vrot.slane %v870_v21, 6 }
 0xaca   :  { %v869_v19 = vunpack.c.l.b16 %v850_v14  ;;  %v845_v20 = vadd.f32 %v975_v62, %v835_v15 }
 0xacb   :  { %v871_v22 = vunpack.c.l.b16 %v852_v16 }
 0xacc   :  { %v849_v23 = vpack.c.bf16 %v845_v20, %v845_v20  ;;  %v872_v24 = vrot.slane %v869_v19, 7 }
 0xacd   :  { %v878_v17 = vrot.slane %v871_v22, 5 }
 0xace   :  { %v868_v25 = vunpack.c.l.b16 %v849_v23 }
 0xad0   :  { %v874_v27 = vsel %vm873_vm3, %v872_v24, %v868_v25 }
 0xad1   :  { %v877_v28 = vsel %vm876_vm4, %v875_v26, %v874_v27 }
 0xad2   :  { %v880_v29 = vsel %vm879_vm5, %v878_v17, %v877_v28 }
 0xad3   :  { %v881_v30 = vpack.c.b16 %v880_v29, %v880_v29 }
 0xad5   :  { %1066 = vmatmul.mubr.msk.bf16.vlgmr.msra.gmra.mrb[8].mxu1 %vm66_vm0, %v881_v30 }
 0xba8   :  { %v931_v18 = vpop.f32.mrb[8].mxu1 }
 0xba9   :  { %v932_v31 = vadd.f32 %v976_v54, %v931_v18  ;;  %v1067_v32 = vpop.f32.mrb[9].mxu1 }
 0xbaa   :  { %v934_v12 = vpop.f32.mrb[10].mxu1 }
 0xbab   :  { %1135 = vtanh.f32 %v932_v31  ;;  %v1068_v33 = vpop.f32.mrb[11].mxu1 }
 0xbb5   :  { %v1136_v55 = vpop.eup %1135 }
 0xbb6   :  { %939 = vst.msk [vmem:[%s1439_s18] sm:$0xf] %vm938_vm6, %v1136_v55 }

</bundles_post_ra>
